<compile_context>
chip_gen: v7x
topology: tpu7x:2x2x1
jax: 0.10.0
libtpu: 0.0.40
codegen_flags: <defaults>
</compile_context>

<pallas_src>
import math

import jax
import jax.numpy as jnp
from jax.experimental import pallas as pl
from jax.experimental.pallas import tpu as pltpu


def token_embedding_kernel(x_ref, w_ref, o_ref):
    """Circular conv1d (k=3, no bias) for one batch tile.

    x_ref : (tb, L+2, C)  circularly padded inputs (1 halo row each side of L)
    w_ref : (3, C, D)     packed conv weight, VMEM-resident across the grid
    o_ref : (tb, L, D)

    The 3-tap slab is built in VMEM from static slices of the padded rows;
    HBM only ever sees raw x (+2 halo rows per batch) and the output.
    """
    tb, L, _ = o_ref.shape
    # Hoist weight tap loads out of the (unrolled) batch loop.
    w0 = w_ref[0]
    w1 = w_ref[1]
    w2 = w_ref[2]
    for b in range(tb):          # tb is a small trace-time constant -> unrolled
        xb = x_ref[b]            # (L+2, C) padded rows for this batch
        acc = jnp.dot(xb[0:L], w0, preferred_element_type=jnp.float32)
        acc = acc + jnp.dot(xb[1:L + 1], w1, preferred_element_type=jnp.float32)
        acc = acc + jnp.dot(xb[2:L + 2], w2, preferred_element_type=jnp.float32)
        o_ref[b] = acc.astype(o_ref.dtype)


def token_embedding(x, weight, *, block_bytes=4 * 1024 * 1024,
                    max_batch_tile=8, compute_dtype=None, out_dtype=None):
    """TokenEmbedding forward.

    x:       (B, L, c_in)
    weight:  (d_model, c_in, 3)   (PyTorch Conv1d weight layout)
    returns  (B, L, d_model)

    block_bytes: target output bytes per grid step (~4 MiB default; v6e is
        happy with 1-2 MiB, v7x benefits from 4-8 MiB, v5e should stay <=4 MiB
        under its 16 MiB default scoped VMEM).
    compute_dtype: e.g. jnp.bfloat16 — casts x and the weight; accumulation
        stays f32 in the kernel.  The output dtype follows compute_dtype
        unless out_dtype overrides it (halves the dominant HBM output stream).
    """
    B, L, C = x.shape
    D = weight.shape[0]
    if out_dtype is None:
        out_dtype = x.dtype if compute_dtype is None else compute_dtype
    if compute_dtype is not None:
        x = x.astype(compute_dtype)
        weight = weight.astype(compute_dtype)

    # Circular halo: 1 row on each side along L.  Only 2*C extra elements per
    # batch hit HBM (vs. the previous 3x-sized im2col slab).
    xpad = jnp.concatenate([x[:, -1:, :], x, x[:, :1, :]], axis=1)  # (B, L+2, C)

    # Packed weight: wp[k, c, d] = weight[d, c, k]; tap k pairs with xpad[l+k].
    wp = jnp.transpose(weight, (2, 1, 0))                           # (3, C, D)

    # Batch-tile size: ~block_bytes of output per grid step to amortize the
    # per-grid-step overhead; must divide B; capped so the in-kernel unroll
    # stays small.
    itemsize = jnp.dtype(out_dtype).itemsize
    rows_bytes = max(L * D * itemsize, 1)
    tb = max(1, min(B, max_batch_tile, block_bytes // rows_bytes))
    while B % tb:
        tb -= 1

    out = pl.pallas_call(
        token_embedding_kernel,
        out_shape=jax.ShapeDtypeStruct((B, L, D), out_dtype),
        grid=(B // tb,),
        in_specs=[
            pl.BlockSpec((tb, L + 2, C), lambda i: (i, 0, 0)),
            pl.BlockSpec((3, C, D), lambda i: (0, 0, 0)),   # weight stays resident
        ],
        out_specs=pl.BlockSpec((tb, L, D), lambda i: (i, 0, 0)),
        compiler_params=pltpu.CompilerParams(
            dimension_semantics=("parallel",)),  # megacore-shard batch tiles (v7x)
    )(xpad, wp)
    return out


def kaiming_normal_conv1d_weight(key, d_model, c_in, kernel_size=3):
    """nn.init.kaiming_normal_(mode='fan_in', nonlinearity='leaky_relu')."""
    fan_in = c_in * kernel_size
    gain = math.sqrt(2.0 / (1.0 + 0.01 ** 2))
    std = gain / math.sqrt(fan_in)
    return std * jax.random.normal(key, (d_model, c_in, kernel_size),
                                   dtype=jnp.float32)


def token_embedding_reference(x, weight):
    """Pure-JAX reference of the circular conv1d, for verification."""
    B, L, C = x.shape
    x_pad = jnp.concatenate([x[:, -1:, :], x, x[:, :1, :]], axis=1)  # (B,L+2,C)
    out = jnp.zeros((B, L, weight.shape[0]), jnp.float32)
    for k in range(3):
        out = out + jnp.einsum("blc,cd->bld", x_pad[:, k:k + L, :],
                               weight[:, :, k].T)
    return out


if __name__ == "__main__":
    key = jax.random.PRNGKey(0)
    k_x, k_w = jax.random.split(key)

    # Small but lane-dense demo: d_model multiple of 128 (per perf review),
    # FEDformer-like c_in.
    B, L, C_IN, D_MODEL = 2, 32, 7, 128
    x = jax.random.normal(k_x, (B, L, C_IN), dtype=jnp.float32)
    weight = kaiming_normal_conv1d_weight(k_w, D_MODEL, C_IN, 3)

    ref = token_embedding_reference(x, weight)

    # f32 path: exact match against the reference.
    out = jax.block_until_ready(token_embedding(x, weight))
    assert out.shape == (B, L, D_MODEL), out.shape
    assert jnp.allclose(out, ref, atol=1e-5, rtol=1e-5), "f32 mismatch vs reference"

    # bf16 path: f32 accumulation in-kernel, bf16 in/out streams; quantization
    # error only, so a loose tolerance is expected.
    out_bf16 = jax.block_until_ready(
        token_embedding(x, weight, compute_dtype=jnp.bfloat16))
    assert out_bf16.dtype == jnp.bfloat16
    assert jnp.allclose(out_bf16.astype(jnp.float32), ref,
                        atol=5e-2, rtol=5e-2), "bf16 mismatch vs reference"

    print("KERNEL_OK")
</pallas_src>

<mosaic_0001>
module attributes {stable_mosaic.version = 11 : i64} {
  func.func @token_embedding_kernel(%arg0: i32, %arg1: memref<2x34x7xf32, #tpu.memory_space<vmem>>, %arg2: memref<3x7x128xf32, #tpu.memory_space<vmem>>, %arg3: memref<2x32x128xf32, #tpu.memory_space<vmem>>) attributes {dimension_semantics = [#tpu.dimension_semantics<parallel>], iteration_bounds = array<i64: 1>, scalar_prefetch = 0 : i64, scratch_operands = 0 : i64, tpu.core_type = #tpu.core_type<tc>, window_params = [{transform_indices = @transform_0, window_bounds = array<i64: 2, 34, 7>}, {pipeline_mode = #tpu.pipeline_mode<synchronous>, transform_indices = @transform_1, window_bounds = array<i64: 3, 7, 128>}, {transform_indices = @transform_2, window_bounds = array<i64: 2, 32, 128>}]} {
    %c0 = arith.constant 0 : index
    %c0_0 = arith.constant 0 : index
    %c0_1 = arith.constant 0 : index
    %0 = vector.load %arg2[%c0, %c0_0, %c0_1] : memref<3x7x128xf32, #tpu.memory_space<vmem>>, vector<1x7x128xf32>
    %1 = vector.shape_cast %0 : vector<1x7x128xf32> to vector<7x128xf32>
    %c1 = arith.constant 1 : index
    %c0_2 = arith.constant 0 : index
    %c0_3 = arith.constant 0 : index
    %2 = vector.load %arg2[%c1, %c0_2, %c0_3] : memref<3x7x128xf32, #tpu.memory_space<vmem>>, vector<1x7x128xf32>
    %3 = vector.shape_cast %2 : vector<1x7x128xf32> to vector<7x128xf32>
    %c2 = arith.constant 2 : index
    %c0_4 = arith.constant 0 : index
    %c0_5 = arith.constant 0 : index
    %4 = vector.load %arg2[%c2, %c0_4, %c0_5] : memref<3x7x128xf32, #tpu.memory_space<vmem>>, vector<1x7x128xf32>
    %5 = vector.shape_cast %4 : vector<1x7x128xf32> to vector<7x128xf32>
    %c0_6 = arith.constant 0 : index
    %c0_7 = arith.constant 0 : index
    %c0_8 = arith.constant 0 : index
    %6 = vector.load %arg1[%c0_6, %c0_7, %c0_8] : memref<2x34x7xf32, #tpu.memory_space<vmem>>, vector<1x34x7xf32>
    %7 = vector.shape_cast %6 : vector<1x34x7xf32> to vector<34x7xf32>
    %8 = vector.extract_strided_slice %7 {offsets = [0, 0], sizes = [32, 7], strides = [1, 1]} : vector<34x7xf32> to vector<32x7xf32>
    %cst = arith.constant dense<0.000000e+00> : vector<32x128xf32>
    %9 = tpu.matmul %8, %1, %cst {dimension_numbers = #tpu.dot_dimension_numbers<[1], [0], [0], [1], [0, 0, 1, 1], [], []>} : vector<32x7xf32>, vector<7x128xf32>, vector<32x128xf32> -> vector<32x128xf32>
    %10 = vector.extract_strided_slice %7 {offsets = [1, 0], sizes = [32, 7], strides = [1, 1]} : vector<34x7xf32> to vector<32x7xf32>
    %cst_9 = arith.constant dense<0.000000e+00> : vector<32x128xf32>
    %11 = tpu.matmul %10, %3, %cst_9 {dimension_numbers = #tpu.dot_dimension_numbers<[1], [0], [0], [1], [0, 0, 1, 1], [], []>} : vector<32x7xf32>, vector<7x128xf32>, vector<32x128xf32> -> vector<32x128xf32>
    %12 = arith.addf %9, %11 : vector<32x128xf32>
    %13 = vector.extract_strided_slice %7 {offsets = [2, 0], sizes = [32, 7], strides = [1, 1]} : vector<34x7xf32> to vector<32x7xf32>
    %cst_10 = arith.constant dense<0.000000e+00> : vector<32x128xf32>
    %14 = tpu.matmul %13, %5, %cst_10 {dimension_numbers = #tpu.dot_dimension_numbers<[1], [0], [0], [1], [0, 0, 1, 1], [], []>} : vector<32x7xf32>, vector<7x128xf32>, vector<32x128xf32> -> vector<32x128xf32>
    %15 = arith.addf %12, %14 : vector<32x128xf32>
    %c0_11 = arith.constant 0 : index
    %c0_12 = arith.constant 0 : index
    %c0_13 = arith.constant 0 : index
    %16 = vector.load %arg3[%c0_11, %c0_12, %c0_13] : memref<2x32x128xf32, #tpu.memory_space<vmem>>, vector<1x32x128xf32>
    %17 = vector.shape_cast %16 : vector<1x32x128xf32> to vector<32x128xf32>
    %18 = vector.shape_cast %15 : vector<32x128xf32> to vector<1x32x128xf32>
    tpu.vector_store %arg3[%c0_11, %c0_12, %c0_13], %18 {strides = array<i32>} : memref<2x32x128xf32, #tpu.memory_space<vmem>>, vector<1x32x128xf32>,
    %c1_14 = arith.constant 1 : index
    %c0_15 = arith.constant 0 : index
    %c0_16 = arith.constant 0 : index
    %19 = vector.load %arg1[%c1_14, %c0_15, %c0_16] : memref<2x34x7xf32, #tpu.memory_space<vmem>>, vector<1x34x7xf32>
    %20 = vector.shape_cast %19 : vector<1x34x7xf32> to vector<34x7xf32>
    %21 = vector.extract_strided_slice %20 {offsets = [0, 0], sizes = [32, 7], strides = [1, 1]} : vector<34x7xf32> to vector<32x7xf32>
    %cst_17 = arith.constant dense<0.000000e+00> : vector<32x128xf32>
    %22 = tpu.matmul %21, %1, %cst_17 {dimension_numbers = #tpu.dot_dimension_numbers<[1], [0], [0], [1], [0, 0, 1, 1], [], []>} : vector<32x7xf32>, vector<7x128xf32>, vector<32x128xf32> -> vector<32x128xf32>
    %23 = vector.extract_strided_slice %20 {offsets = [1, 0], sizes = [32, 7], strides = [1, 1]} : vector<34x7xf32> to vector<32x7xf32>
    %cst_18 = arith.constant dense<0.000000e+00> : vector<32x128xf32>
    %24 = tpu.matmul %23, %3, %cst_18 {dimension_numbers = #tpu.dot_dimension_numbers<[1], [0], [0], [1], [0, 0, 1, 1], [], []>} : vector<32x7xf32>, vector<7x128xf32>, vector<32x128xf32> -> vector<32x128xf32>
    %25 = arith.addf %22, %24 : vector<32x128xf32>
    %26 = vector.extract_strided_slice %20 {offsets = [2, 0], sizes = [32, 7], strides = [1, 1]} : vector<34x7xf32> to vector<32x7xf32>
    %cst_19 = arith.constant dense<0.000000e+00> : vector<32x128xf32>
    %27 = tpu.matmul %26, %5, %cst_19 {dimension_numbers = #tpu.dot_dimension_numbers<[1], [0], [0], [1], [0, 0, 1, 1], [], []>} : vector<32x7xf32>, vector<7x128xf32>, vector<32x128xf32> -> vector<32x128xf32>
    %28 = arith.addf %25, %27 : vector<32x128xf32>
    %c1_20 = arith.constant 1 : index
    %c0_21 = arith.constant 0 : index
    %c0_22 = arith.constant 0 : index
    %29 = vector.load %arg3[%c1_20, %c0_21, %c0_22] : memref<2x32x128xf32, #tpu.memory_space<vmem>>, vector<1x32x128xf32>
    %30 = vector.shape_cast %29 : vector<1x32x128xf32> to vector<32x128xf32>
    %31 = vector.shape_cast %28 : vector<32x128xf32> to vector<1x32x128xf32>
    tpu.vector_store %arg3[%c1_20, %c0_21, %c0_22], %31 {strides = array<i32>} : memref<2x32x128xf32, #tpu.memory_space<vmem>>, vector<1x32x128xf32>,
    return
  }
  func.func @transform_0(%arg0: i32) -> (i32, i32, i32) {
    %c0_i32 = arith.constant 0 : i32
    %c0_i32_0 = arith.constant 0 : i32
    %c0_i32_1 = arith.constant 0 : i32
    return %arg0, %c0_i32, %c0_i32_0 : i32, i32, i32
  }
  func.func @transform_1(%arg0: i32) -> (i32, i32, i32) {
    %c0_i32 = arith.constant 0 : i32
    %c0_i32_0 = arith.constant 0 : i32
    %c0_i32_1 = arith.constant 0 : i32
    %c0_i32_2 = arith.constant 0 : i32
    return %c0_i32, %c0_i32_0, %c0_i32_1 : i32, i32, i32
  }
  func.func @transform_2(%arg0: i32) -> (i32, i32, i32) {
    %c0_i32 = arith.constant 0 : i32
    %c0_i32_0 = arith.constant 0 : i32
    %c0_i32_1 = arith.constant 0 : i32
    return %arg0, %c0_i32, %c0_i32_0 : i32, i32, i32
  }
}

</mosaic_0001>

<bundles_post_ra>
// kernel: tpu_custom_call.1
= control target key start
LH: loop header
LB: loop body
LE: loop exit
PB: predicated region body
PF: predicated region fallthrough
CT: control target
= control target key end

     0   :  { %vm27_vm0 = vcmask 1046528   ;;  %vm37_vm1 = vcmask 56320   ;;  %s991_s0 = inlined_call_operand.vmem [shape: f32[2,34,7], index: 0, kind: input, shape index: {}]   ;;  %s992_s1 = inlined_call_operand.vmem [shape: f32[3,7,128], index: 1, kind: input, shape index: {}]   ;;  %s993_s2 = inlined_call_operand.hbm [shape: f32[2,32,128], index: 2, kind: output, shape index: {}]  }
   0x1   :  { %v677_v0 = vld [vmem:[%s992_s1 + $0x8] sm:$0x7f]  ;;  %v859_v1 = vld [vmem:[%s991_s0] sm:$0xff]  ;;  %v879_v7 = vld [vmem:[%s991_s0 + $0x30] sm:$0xff] }
   0x2   :  { %v864_v2 = vld [vmem:[%s991_s0 + $0x8] sm:$0xff]  ;;  %744 = vmatprep.subr.msk.mxu0 %vm27_vm0, %v677_v0  ;;  %768 = vmatprep.subr.msk.mxu1 %vm27_vm0, %v677_v0  ;;  %v28_v3 = vrot.slane %v859_v1, 1  ;;  %v12_v5 = vld [vmem:[%s992_s1] sm:$0x7f]  ;;  %v356_v9 = vrot.slane %v879_v7, 1  ;;  %v887_v10 = vld [vmem:[%s991_s0 + $0x10] sm:$0xff] }
   0x3   :  { %v29_v4 = vrot.slane %v864_v2, 1  ;;  %v694_v6 = vld [vmem:[%s991_s0 + $0x28] sm:$0xff]  ;;  %745 = vmatpush3.msk.msra.mxu0 %vm27_vm0, %v677_v0  ;;  %769 = vmatpush3.msk.msra.mxu1 %vm27_vm0, %v677_v0  ;;  %v892_v11 = vld [vmem:[%s991_s0 + $0x38] sm:$0xff]  ;;  %v31_v14 = vrot.slane %v887_v10, 1  ;;  %v907_v16 = vld [vmem:[%s991_s0 + $0x40] sm:$0xff] }
   0x4   :  { %v355_v8 = vrot.slane %v694_v6, 1  ;;  %v897_v12 = vld [vmem:[%s991_s0 + $0x18] sm:$0xff]  ;;  %752 = vmatprep.subr.msk.mxu0 %vm27_vm0, %v12_v5  ;;  %776 = vmatprep.subr.msk.mxu1 %vm27_vm0, %v12_v5  ;;  %v358_v15 = vrot.slane %v892_v11, 1  ;;  %v21_v17 = vld [vmem:[%s991_s0 + $0x20] sm:$0x3]  ;;  %v360_v20 = vrot.slane %v907_v16, 1 }
   0x5   :  { %v30_v13 = vsel %vm27_vm0, %v28_v3, %v29_v4  ;;  %v33_v19 = vrot.slane %v897_v12, 1  ;;  %v698_v21 = vld [vmem:[%s991_s0 + $0x48] sm:$0x3]  ;;  %v32_v22 = vsel %vm27_vm0, %v29_v4, %v31_v14  ;;  %v35_v24 = vrot.slane %v21_v17, 1 }
   0x6   :  { %746 = vmatprep.mubr.msk.f32.mxu0 %vm37_vm1, %v30_v13  ;;  %v357_v18 = vsel %vm27_vm0, %v355_v8, %v356_v9  ;;  %v359_v23 = vsel %vm27_vm0, %v356_v9, %v358_v15  ;;  %v362_v25 = vrot.slane %v698_v21, 1 }
   0x7   :  { %770 = vmatprep.mubr.msk.f32.mxu1 %vm37_vm1, %v357_v18 }
   0x8   :  { %7 = vsyncpa [#allocation3], 0  ;;  %747 = vmatmul.mubr.msk.f32.vlgmr.msra.gmra.mrb[0].mxu0 %vm37_vm1, %v32_v22  ;;  %771 = vmatmul.mubr.msk.f32.vlgmr.msra.gmra.mrb[0].mxu1 %vm37_vm1, %v359_v23  ;;  %v34_v26 = vsel %vm27_vm0, %v31_v14, %v33_v19  ;;  %v361_v27 = vsel %vm27_vm0, %v358_v15, %v360_v20  ;;  %v678_v28 = vld [vmem:[%s992_s1 + $0x10] sm:$0x7f]  ;;  %v36_v29 = vsel %vm27_vm0, %v33_v19, %v35_v24  ;;  %v231_v31 = vrot.slane %v859_v1, 2  ;;  %s835_s0 = smov [#allocation2]  }
   0x9   :  { %753 = vmatpush3.msk.msra.mxu0 %vm27_vm0, %v12_v5  ;;  %777 = vmatpush3.msk.msra.mxu1 %vm27_vm0, %v12_v5  ;;  %v363_v30 = vsel %vm27_vm0, %v360_v20, %v362_v25  ;;  %v232_v32 = vrot.slane %v864_v2, 2  ;;  %v550_v33 = vrot.slane %v694_v6, 2  ;;  %v551_v34 = vrot.slane %v879_v7, 2  ;;  %s666_s1 = sshll.u32 %s835_s0, 4  ;;  %s667_s1 = int_to_ptr.vmem [resolvable:$true] %s666_s1 }
   0xa   :  { %749 = vmatprep.mubr.msk.f32.mxu0 %vm37_vm1, %v34_v26  ;;  %773 = vmatprep.mubr.msk.f32.mxu1 %vm37_vm1, %v361_v27  ;;  %vm230_vm2 = vcmask 1045504   ;;  %v234_v35 = vrot.slane %v887_v10, 2  ;;  %v553_v36 = vrot.slane %v892_v11, 2  ;;  %v236_v39 = vrot.slane %v897_v12, 2  ;;  %s811_s7 = scalar_lea.vmem %s667_s1, 1024  ;;  %p816_p1 = scmp.lt.s32.totalorder %s667_s1, %s667_s1 }
   0xb   :  { %760 = vmatprep.subr.msk.mxu0 %vm27_vm0, %v678_v28  ;;  %784 = vmatprep.subr.msk.mxu1 %vm27_vm0, %v678_v28  ;;  %v233_v37 = vsel %vm230_vm2, %v231_v31, %v232_v32  ;;  %v552_v38 = vsel %vm230_vm2, %v550_v33, %v551_v34  ;;  %v555_v40 = vrot.slane %v907_v16, 2  ;;  %v238_v43 = vrot.slane %v21_v17, 2  ;;  %p812_p0 = scmp.ne.s32.totalorder %s667_s1, %s811_s7  ;;  %p817_p2 = scmp.lt.s32.totalorder %s811_s7, %s811_s7 }
   0xc   :  { %750 = vmatmul.mubr.msk.f32.gmra.mrb[2].mxu0 %vm37_vm1, %v36_v29  ;;  %774 = vmatmul.mubr.msk.f32.gmra.mrb[2].mxu1 %vm37_vm1, %v363_v30  ;;  %v235_v41 = vsel %vm230_vm2, %v232_v32, %v234_v35  ;;  %v554_v42 = vsel %vm230_vm2, %v551_v34, %v553_v36  ;;  %v557_v44 = vrot.slane %v698_v21, 2  ;;  %v237_v45 = vsel %vm230_vm2, %v234_v35, %v236_v39 }
   0xd   :  { %754 = vmatprep.mubr.msk.f32.mxu0 %vm37_vm1, %v859_v1  ;;  %778 = vmatprep.mubr.msk.f32.mxu1 %vm37_vm1, %v694_v6  ;;  %v556_v46 = vsel %vm230_vm2, %v553_v36, %v555_v40  ;;  %v239_v47 = vsel %vm230_vm2, %v236_v39, %v238_v43  ;;  %p818_p3 = por %p817_p2, %p816_p1 }
   0xe   :  { %v558_v48 = vsel %vm230_vm2, %v555_v40, %v557_v44 }
   0xf   :  { %p819_p4 = pnand %p818_p3, %p812_p0 }
  0x10   :  { %755 = vmatmul.mubr.msk.f32.vlgmr.msra.gmra.mrb[0].mxu0 %vm37_vm1, %v864_v2  ;;  %779 = vmatmul.mubr.msk.f32.vlgmr.msra.gmra.mrb[0].mxu1 %vm37_vm1, %v879_v7 }
  0x11   :  { %761 = vmatpush3.msk.msra.mxu0 %vm27_vm0, %v678_v28  ;;  %785 = vmatpush3.msk.msra.mxu1 %vm27_vm0, %v678_v28 }
  0x12   :  { %757 = vmatprep.mubr.msk.f32.mxu0 %vm37_vm1, %v887_v10  ;;  %781 = vmatprep.mubr.msk.f32.mxu1 %vm37_vm1, %v892_v11 }
  0x14   :  { %758 = vmatmul.mubr.msk.f32.gmra.mrb[2].mxu0 %vm37_vm1, %v897_v12  ;;  %782 = vmatmul.mubr.msk.f32.gmra.mrb[2].mxu1 %vm37_vm1, %v907_v16 }
  0x15   :  { %762 = vmatprep.mubr.msk.f32.mxu0 %vm37_vm1, %v233_v37  ;;  %786 = vmatprep.mubr.msk.f32.mxu1 %vm37_vm1, %v552_v38 }
  0x18   :  { %763 = vmatmul.mubr.msk.f32.vlgmr.msra.gmra.mrb[0].mxu0 %vm37_vm1, %v235_v41  ;;  %787 = vmatmul.mubr.msk.f32.vlgmr.msra.gmra.mrb[0].mxu1 %vm37_vm1, %v554_v42 }
  0x19   :  { %765 = vmatprep.mubr.msk.f32.mxu0 %vm37_vm1, %v237_v45  ;;  %789 = vmatprep.mubr.msk.f32.mxu1 %vm37_vm1, %v556_v46 }
  0x1c   :  { %766 = vmatmul.mubr.msk.f32.gmra.mrb[2].mxu0 %vm37_vm1, %v239_v47  ;;  %790 = vmatmul.mubr.msk.f32.gmra.mrb[2].mxu1 %vm37_vm1, %v558_v48 }
  0xeb   :  { %v764_v49 = vpop.f32.mrb[0].mxu0  ;;  %v788_v50 = vpop.f32.mrb[0].mxu1 }
  0xec   :  { %341 = vst [vmem:[#allocation2 + $0x8] sm:$0xff] %v764_v49  ;;  %658 = vst [vmem:[#allocation2 + $0x28] sm:$0xff] %v788_v50  ;;  %v317_v51 = vpop.f32.mrb[1].mxu0  ;;  %v633_v52 = vpop.f32.mrb[1].mxu1 }
  0xed   :  { %340 = vst [vmem:[#allocation2] sm:$0xff] %v317_v51  ;;  %657 = vst [vmem:[#allocation2 + $0x20] sm:$0xff] %v633_v52 }
  0xef   :  { %v767_v53 = vpop.f32.mrb[2].mxu0  ;;  %v791_v54 = vpop.f32.mrb[2].mxu1 }
  0xf0   :  { %343 = vst [vmem:[#allocation2 + $0x18] sm:$0xff] %v767_v53  ;;  %660 = vst [vmem:[#allocation2 + $0x38] sm:$0xff] %v791_v54  ;;  %v327_v55 = vpop.f32.mrb[3].mxu0  ;;  %v643_v56 = vpop.f32.mrb[3].mxu1 }
  0xf1   :  { %342 = vst [vmem:[#allocation2 + $0x10] sm:$0xff] %v327_v55  ;;  %659 = vst [vmem:[#allocation2 + $0x30] sm:$0xff] %v643_v56 }
  0xf2   :  { %822 = shalt.err (!%p819_p4)
}
  0xf3   :  { %s823_s10 = scalar_lea.hbm %s993_s2, 1024 }
  0xf4   :  { %p824_p5 = scmp.ne.s32.totalorder %s993_s2, %s823_s10  ;;  %p827_p6 = scmp.lt.u32.totalorder %s823_s10, %s993_s2 }
  0xf6   :  { %p829_p7 = pnand %p827_p6, %p824_p5 }
  0xf8   :  { %832 = shalt.err (!%p829_p7)
}
  0xf9   :  { %s836_s15 = smov 128   ;;  %s837_s16 = smov 8  }
  0xfa   :  { %672 = dma.vmem_to_hbm [thread:$0]  %s667_s1, 1024, %s993_s2, [#allocation3], %s836_s15, %s836_s15, %s837_s16  }
  0xfb   :  { %833 = dma.done.wait [#allocation3], 1024  }
  0xfc   :  { %834 = vsyncadd [#allocation3], 4294966272 }
  0xfd   :  { %676 = vsyncpa [#allocation3], 1 }

</bundles_post_ra>
